<compile_context>
chip_gen: v6e
topology: v6e:2x2x1
jax: 0.10.0
libtpu: 0.0.40
codegen_flags: <defaults>
</compile_context>

<pallas_src>
import functools

import jax
import jax.numpy as jnp
from jax.experimental import pallas as pl
from jax.experimental.pallas import tpu as pltpu


# ----------------------------------------------------------------------------
# Kernels: fused per-element affine  y = scale * x + shift
# ----------------------------------------------------------------------------

def _affine_row_params_kernel(p_ref, x_ref, o_ref, *, compute_dtype):
    # p_ref: (tile_r, 2) f32 packed [scale, shift] per row; x/o: (tile_r, tile_l).
    p = p_ref[...].astype(compute_dtype)
    x = x_ref[...].astype(compute_dtype)
    o_ref[...] = (x * p[:, 0:1] + p[:, 1:2]).astype(o_ref.dtype)


def _affine_lane_params_kernel(p_ref, x_ref, o_ref, *, compute_dtype):
    # p_ref: (2, tile_l) f32 packed [scale; shift] per lane; x/o: (tile_n, tile_l).
    p = p_ref[...].astype(compute_dtype)
    x = x_ref[...].astype(compute_dtype)
    o_ref[...] = (x * p[0:1, :] + p[1:2, :]).astype(o_ref.dtype)


# ----------------------------------------------------------------------------
# Tile selection
# ----------------------------------------------------------------------------

def _pick_tiles(R, L, itemsize, *,
                per_buffer_bytes=4 * 1024 * 1024,   # hard cap per x (and out) tile
                min_tile_bytes=2 * 1024 * 1024,     # keep per-step overhead <~2% (v5e)
                target_steps=8,                     # >=~8 tiles: pipelining + megacore
                max_rows=4096):                     # bounds lane-padded param buffer
    sub = max(8, 32 // itemsize)                    # sublane packing for streamed dtype
    total_bytes = R * L * itemsize
    tile_bytes = min(per_buffer_bytes,
                     max(min_tile_bytes, -(-total_bytes // target_steps)))
    row_bytes = L * itemsize

    if sub * row_bytes <= per_buffer_bytes:
        # Full-width lane tiles: each DMA is one contiguous HBM region and
        # every store is lane-dense (no ragged lane tail).
        tile_l = L
        rows = min(max(sub, tile_bytes // row_bytes), max_rows)
        tile_r = R if rows >= R else max(sub, (rows // sub) * sub)
    else:
        # Extremely wide rows: split lanes into 128-multiples.
        tile_r = R if R <= sub else sub
        max_l = max(128, (per_buffer_bytes // (tile_r * itemsize) // 128) * 128)
        tile_l = L if L <= max_l else max_l

    # Prefer an even number of row tiles so v7x's two TensorCores split evenly.
    if tile_l == L and sub < tile_r < R:
        t = tile_r
        while t > sub and (-(-R // t)) % 2 == 1:
            t -= sub
        if (-(-R // t)) % 2 == 0:
            tile_r = t

    return tile_r, tile_l


# ----------------------------------------------------------------------------
# Wrapper: _CompositeBatchNorm.forward
# ----------------------------------------------------------------------------

def composite_batchnorm(x, weight, composite_mean, composite_var,
                        composite_weight, composite_bias,
                        *, eps=1e-5, mode='naive', donate_x=False):
    """Pallas implementation of _CompositeBatchNorm.forward (affine=True)."""
    N, C, H, W = x.shape
    K, Cp = composite_mean.shape
    assert Cp == C, "composite buffers must have num_features == C"

    # ---- Fold the K BatchNorms into a single per-channel scale/shift (f32). --
    if mode == 'naive':
        assert weight.shape == (K,), "mode='naive' expects weight of shape (K,)"
        w_kc = weight.astype(jnp.float32)[:, None]          # (K, 1) -> bcast (K, C)
    elif mode == 'channel':
        assert weight.shape == (K, C), "mode='channel' expects weight of shape (K, C)"
        w_kc = weight.astype(jnp.float32)                    # (K, C)
    else:
        raise ValueError('mode {} not supported.'.format(mode))

    var_f = composite_var.astype(jnp.float32)
    mean_f = composite_mean.astype(jnp.float32)
    gamma_f = composite_weight.astype(jnp.float32)
    beta_f = composite_bias.astype(jnp.float32)

    inv_std = jax.lax.rsqrt(var_f + eps)                      # (K, C)
    scale_c = jnp.sum(w_kc * gamma_f * inv_std, axis=0)       # (C,)
    shift_c = jnp.sum(w_kc * (beta_f - mean_f * gamma_f * inv_std), axis=0)  # (C,)

    # ---- dtype / compute path -------------------------------------------------
    x_dt = jnp.dtype(x.dtype)
    itemsize = x_dt.itemsize
    if x_dt in (jnp.dtype(jnp.float32), jnp.dtype(jnp.bfloat16)):
        compute_dtype = x_dt        # native bf16 FMA on v6e/v7x; exact f32 path for f32
    else:
        compute_dtype = jnp.float32

    HW = H * W
    use_lane_params = HW < 256      # small / ragged spatial -> lane-major layout

    if not use_lane_params:
        # Layout A: rows = (n, c), lanes = spatial. Per-row params.
        R, L = N * C, HW
        x2 = x.reshape(R, L)                                  # pure reshape
        params = jnp.stack([jnp.tile(scale_c, N),
                            jnp.tile(shift_c, N)], axis=1)    # (R, 2) f32
        tile_r, tile_l = _pick_tiles(R, L, itemsize)
        param_spec = pl.BlockSpec((tile_r, 2), lambda r, l: (r, 0))
        kernel = functools.partial(_affine_row_params_kernel,
                                   compute_dtype=compute_dtype)
    else:
        # Layout B: rows = batch, lanes = (c, spatial). Per-lane params keep the
        # lane dim dense even for 7x7 / 14x14 feature maps.
        R, L = N, C * HW
        x2 = x.reshape(R, L)                                  # pure reshape
        params = jnp.stack([jnp.repeat(scale_c, HW),
                            jnp.repeat(shift_c, HW)], axis=0)  # (2, L) f32
        tile_r, tile_l = _pick_tiles(R, L, itemsize)
        param_spec = pl.BlockSpec((2, tile_l), lambda r, l: (0, l))
        kernel = functools.partial(_affine_lane_params_kernel,
                                   compute_dtype=compute_dtype)

    grid = (pl.cdiv(R, tile_r), pl.cdiv(L, tile_l))
    x_spec = pl.BlockSpec((tile_r, tile_l), lambda r, l: (r, l))

    y2 = pl.pallas_call(
        kernel,
        out_shape=jax.ShapeDtypeStruct((R, L), x.dtype),
        grid_spec=pltpu.PrefetchScalarGridSpec(
            num_scalar_prefetch=0,
            grid=grid,
            in_specs=[param_spec, x_spec],
            out_specs=x_spec,
        ),
        compiler_params=pltpu.CompilerParams(
            dimension_semantics=("parallel", "parallel"),
            vmem_limit_bytes=32 * 1024 * 1024,
        ),
        input_output_aliases=({1: 0} if donate_x else {}),
    )(params, x2)

    # Pure reshape back to NCHW (no transpose needed in either layout).
    return y2.reshape(N, C, H, W)


# ----------------------------------------------------------------------------
# Pure-JAX reference (transcription of the PyTorch forward)
# ----------------------------------------------------------------------------

def _reference(x, weight, mean, var, gamma, beta, *, eps, mode):
    N, C, H, W = x.shape
    flat_x = jnp.transpose(x, (1, 0, 2, 3)).reshape(C, -1).astype(jnp.float32)
    flat_y = jnp.zeros_like(flat_x)
    K = mean.shape[0]
    for i in range(K):
        w_i = weight[i] if mode == 'naive' else weight[i][:, None]
        flat_y = flat_y + w_i * (
            (flat_x - mean[i][:, None]) * jax.lax.rsqrt(var[i][:, None] + eps)
            * gamma[i][:, None] + beta[i][:, None])
    y = jnp.transpose(flat_y.reshape(C, N, H, W), (1, 0, 2, 3))
    return y.astype(x.dtype)


if __name__ == "__main__":
    # K = 3 constituent BatchNorm2d layers, num_features C = 4,
    # input x: NCHW = (2, 4, 16, 16).
    N, C, H, W = 2, 4, 16, 16
    K = 3
    eps = 1e-5

    key = jax.random.PRNGKey(0)
    kx, km, kv, kg, kb, kw, kx2 = jax.random.split(key, 7)

    x = jax.random.normal(kx, (N, C, H, W), dtype=jnp.float32)

    composite_mean = 0.1 * jax.random.normal(km, (K, C), dtype=jnp.float32)
    composite_var = jnp.abs(jax.random.normal(kv, (K, C), dtype=jnp.float32)) + 0.5
    composite_weight = 1.0 + 0.1 * jax.random.normal(kg, (K, C), dtype=jnp.float32)
    composite_bias = 0.1 * jax.random.normal(kb, (K, C), dtype=jnp.float32)

    # ---- mode='naive', init='auto': weight filled with 1 / num_composition ----
    w_naive = jnp.full((K,), 1.0 / K, dtype=jnp.float32)
    y = composite_batchnorm(x, w_naive, composite_mean, composite_var,
                            composite_weight, composite_bias,
                            eps=eps, mode='naive')
    y = jax.block_until_ready(y)
    y_ref = _reference(x, w_naive, composite_mean, composite_var,
                       composite_weight, composite_bias, eps=eps, mode='naive')
    assert y.shape == (N, C, H, W)
    assert jnp.allclose(y, y_ref, atol=1e-5, rtol=1e-5), \
        "Pallas output (mode='naive') does not match reference"

    # ---- mode='channel': per-channel mixing weights of shape (K, C) ----------
    w_chan = (1.0 / K) + 0.05 * jax.random.normal(kw, (K, C), dtype=jnp.float32)
    y2 = composite_batchnorm(x, w_chan, composite_mean, composite_var,
                             composite_weight, composite_bias,
                             eps=eps, mode='channel')
    y2 = jax.block_until_ready(y2)
    y2_ref = _reference(x, w_chan, composite_mean, composite_var,
                        composite_weight, composite_bias, eps=eps, mode='channel')
    assert jnp.allclose(y2, y2_ref, atol=1e-5, rtol=1e-5), \
        "Pallas output (mode='channel') does not match reference"

    # ---- small spatial (7x7): exercises the lane-params layout ----------------
    Hs = Ws = 7
    xs = jax.random.normal(kx2, (N, C, Hs, Ws), dtype=jnp.float32)
    y3 = composite_batchnorm(xs, w_chan, composite_mean, composite_var,
                             composite_weight, composite_bias,
                             eps=eps, mode='channel')
    y3 = jax.block_until_ready(y3)
    y3_ref = _reference(xs, w_chan, composite_mean, composite_var,
                        composite_weight, composite_bias, eps=eps, mode='channel')
    assert jnp.allclose(y3, y3_ref, atol=1e-5, rtol=1e-5), \
        "Pallas output (small spatial, lane-params layout) does not match reference"

    print("KERNEL_OK")
</pallas_src>

<mosaic_0001>
module attributes {stable_mosaic.version = 11 : i64} {
  func.func @_affine_row_params_kernel(%arg0: i32, %arg1: i32, %arg2: memref<8x2xf32, #tpu.memory_space<vmem>>, %arg3: memref<8x256xf32, #tpu.memory_space<vmem>>, %arg4: memref<8x256xf32, #tpu.memory_space<vmem>>) attributes {dimension_semantics = [#tpu.dimension_semantics<parallel>, #tpu.dimension_semantics<parallel>], iteration_bounds = array<i64: 1, 1>, scalar_prefetch = 0 : i64, scratch_operands = 0 : i64, tpu.core_type = #tpu.core_type<tc>, window_params = [{transform_indices = @transform_0, window_bounds = array<i64: 8, 2>}, {transform_indices = @transform_1, window_bounds = array<i64: 8, 256>}, {transform_indices = @transform_2, window_bounds = array<i64: 8, 256>}]} {
    %c0 = arith.constant 0 : index
    %c0_0 = arith.constant 0 : index
    %0 = vector.load %arg2[%c0, %c0_0] : memref<8x2xf32, #tpu.memory_space<vmem>>, vector<8x2xf32>
    %c0_1 = arith.constant 0 : index
    %c0_2 = arith.constant 0 : index
    %1 = vector.load %arg3[%c0_1, %c0_2] : memref<8x256xf32, #tpu.memory_space<vmem>>, vector<8x256xf32>
    %2 = vector.extract_strided_slice %0 {offsets = [0, 0], sizes = [8, 1], strides = [1, 1]} : vector<8x2xf32> to vector<8x1xf32>
    %3 = vector.broadcast %2 : vector<8x1xf32> to vector<8x256xf32>
    %4 = arith.mulf %1, %3 : vector<8x256xf32>
    %5 = vector.extract_strided_slice %0 {offsets = [0, 1], sizes = [8, 1], strides = [1, 1]} : vector<8x2xf32> to vector<8x1xf32>
    %6 = vector.broadcast %5 : vector<8x1xf32> to vector<8x256xf32>
    %7 = arith.addf %4, %6 : vector<8x256xf32>
    %c0_3 = arith.constant 0 : index
    %c0_4 = arith.constant 0 : index
    %8 = vector.load %arg4[%c0_3, %c0_4] : memref<8x256xf32, #tpu.memory_space<vmem>>, vector<8x256xf32>
    tpu.vector_store %arg4[%c0_3, %c0_4], %7 {strides = array<i32>} : memref<8x256xf32, #tpu.memory_space<vmem>>, vector<8x256xf32>,
    return
  }
  func.func @transform_0(%arg0: i32, %arg1: i32) -> (i32, i32) {
    %c0_i32 = arith.constant 0 : i32
    %c0_i32_0 = arith.constant 0 : i32
    return %arg0, %c0_i32 : i32, i32
  }
  func.func @transform_1(%arg0: i32, %arg1: i32) -> (i32, i32) {
    %c0_i32 = arith.constant 0 : i32
    return %arg0, %arg1 : i32, i32
  }
  func.func @transform_2(%arg0: i32, %arg1: i32) -> (i32, i32) {
    %c0_i32 = arith.constant 0 : i32
    return %arg0, %arg1 : i32, i32
  }
}

</mosaic_0001>

<bundles_post_ra>
// kernel: tpu_custom_call.1
= control target key start
LH: loop header
LB: loop body
LE: loop exit
PB: predicated region body
PF: predicated region fallthrough
CT: control target
= control target key end

     0   :  { %7 = vsyncpa [#allocation3], 0  ;;  %s135_s0 = inlined_call_operand.vmem [shape: f32[8,2], index: 0, kind: input, shape index: {}]   ;;  %s136_s1 = inlined_call_operand.hbm [shape: f32[8,256], index: 1, kind: input, shape index: {}]   ;;  %s137_s2 = inlined_call_operand.hbm [shape: f32[8,256], index: 2, kind: output, shape index: {}]  }
   0x1   :  { %8 = vsyncpa [#allocation4], 0  ;;  %s107_s9 = smov [#allocation2]  }
   0x2   :  { %s17_s10 = sshll.u32 %s107_s9, 4  ;;  %s18_s10 = int_to_ptr.vmem [resolvable:$true] %s17_s10 }
   0x3   :  { %s71_s11 = scalar_lea.vmem %s18_s10, 256  ;;  %p76_p1 = scmp.lt.s32.totalorder %s18_s10, %s18_s10 }
   0x4   :  { %p72_p0 = scmp.ne.s32.totalorder %s18_s10, %s71_s11  ;;  %p77_p2 = scmp.lt.s32.totalorder %s71_s11, %s71_s11 }
   0x6   :  { %p78_p3 = por %p77_p2, %p76_p1 }
   0x8   :  { %p79_p4 = pnand %p78_p3, %p72_p0 }
   0xa   :  { %82 = shalt.err (!%p79_p4)
}
   0xb   :  { %20 = dma.hbm_to_vmem [thread:$0]  %s136_s1, 256, %s18_s10, [#allocation3]  }
   0xc   :  { %103 = dma.done.wait [#allocation3], 256  }
   0xd   :  { %104 = vsyncadd [#allocation3], 4294967040  ;;  %v108_v0 = vmov 0   ;;  %v24_v1 = vld [vmem:[%s135_s0] sm:$0xff]  ;;  %v109_v2 = vmov 1   ;;  %v26_v5 = vld [vmem:[#allocation2 + $0x8] sm:$0xff] }
   0xe   :  { %61 = vset.pattern.permute.xlu0 %v108_v0  ;;  %v25_v4 = vld [vmem:[#allocation2] sm:$0xff]  ;;  %s110_s16 = smov [#allocation5]  }
   0xf   :  { %29 = vperm.xlu0 %61, %v24_v1   ;;  %s48_s17 = sshll.u32 %s110_s16, 4  ;;  %s49_s17 = int_to_ptr.vmem [resolvable:$true] %s48_s17 }
  0x10   :  { %s83_s1 = scalar_lea.vmem %s49_s17, 256  ;;  %p88_p6 = scmp.lt.s32.totalorder %s49_s17, %s49_s17 }
  0x11   :  { %p84_p5 = scmp.ne.s32.totalorder %s49_s17, %s83_s1  ;;  %p89_p7 = scmp.lt.s32.totalorder %s83_s1, %s83_s1 }
  0x13   :  { %62 = vset.pattern.permute.xlu0 %v109_v2  ;;  %p90_p8 = por %p89_p7, %p88_p6 }
  0x14   :  { %35 = vperm.xlu0 %62, %v24_v1  }
  0x15   :  { %p91_p9 = pnand %p90_p8, %p84_p5 }
  0x8a   :  { %v30_v3 = vpop.permute.xlu0 %29 }
  0x8b   :  { %v32_v6 = vmul.f32 %v30_v3, %v25_v4  ;;  %v33_v7 = vmul.f32 %v30_v3, %v26_v5 }
  0x8f   :  { %v36_v8 = vpop.permute.xlu0 %35 }
  0x90   :  { %v38_v9 = vadd.f32 %v36_v8, %v32_v6  ;;  %v39_v10 = vadd.f32 %v36_v8, %v33_v7 }
  0x92   :  { %40 = vst [vmem:[#allocation5] sm:$0xff] %v38_v9  ;;  %41 = vst [vmem:[#allocation5 + $0x8] sm:$0xff] %v39_v10 }
  0x93   :  { %94 = shalt.err (!%p91_p9)
}
  0x94   :  { %51 = dma.vmem_to_hbm [thread:$0]  %s49_s17, 256, %s137_s2, [#allocation4]  }
  0x95   :  { %105 = dma.done.wait [#allocation4], 256  }
  0x96   :  { %106 = vsyncadd [#allocation4], 4294967040 }
  0x97   :  { %55 = vsyncpa [#allocation3], 1 }
  0x98   :  { %56 = vsyncpa [#allocation4], 1 }

</bundles_post_ra>
